<compile_context>
chip_gen: v7x
topology: tpu7x:2x2x1
jax: 0.10.0
libtpu: 0.0.40
codegen_flags: <defaults>
</compile_context>

<pallas_src>
import functools

import jax
import jax.numpy as jnp
from jax.experimental import pallas as pl
from jax.experimental.pallas import tpu as pltpu

_LANE = 128


def _se_block_kernel(x_ref, w1t_ref, b1_ref, w2t_ref, b2_ref, o_ref, acc_ref,
                     *, inv_hw, hw_total, thw, ragged_hw):
    # x_ref:  (TB, C, THW)  one spatial slab of TB batch elements
    # w1t:    (C, Cr)       b1: (1, Cr)
    # w2t:    (Cr, C)       b2: (1, C)
    # o_ref:  (TB, C)       acc_ref: (TB, C) f32 spatial-sum accumulator
    hw_step = pl.program_id(1)
    last_step = pl.num_programs(1) - 1

    @pl.when(hw_step == 0)
    def _init():
        acc_ref[...] = jnp.zeros_like(acc_ref)

    if ragged_hw:
        # Spatial extent does not divide THW: the final block's trailing lanes
        # hold unspecified data, so mask them (cold path, last step only).
        @pl.when(hw_step != last_step)
        def _full_step():
            acc_ref[...] += jnp.sum(x_ref[...], axis=-1, dtype=jnp.float32)

        @pl.when(hw_step == last_step)
        def _ragged_step():
            lane = jax.lax.broadcasted_iota(jnp.int32, (1, 1, thw), 2)
            valid = (hw_step * thw + lane) < hw_total
            x = jnp.where(valid, x_ref[...], 0.0)
            acc_ref[...] += jnp.sum(x, axis=-1, dtype=jnp.float32)
    else:
        acc_ref[...] += jnp.sum(x_ref[...], axis=-1, dtype=jnp.float32)

    @pl.when(hw_step == last_step)
    def _finalize():
        pooled = acc_ref[...] * inv_hw                            # global avg pool
        h = jnp.dot(pooled, w1t_ref[...],                         # 1x1 conv #1
                    preferred_element_type=jnp.float32) + b1_ref[...]
        h = jnp.maximum(h, 0.0)                                   # ReLU
        y = jnp.dot(h, w2t_ref[...],                              # 1x1 conv #2
                    preferred_element_type=jnp.float32) + b2_ref[...]
        o_ref[...] = jax.nn.sigmoid(y).astype(o_ref.dtype)        # Sigmoid


def _hw_params():
    """Per-generation (x-slab target bytes, vmem_limit_bytes, multi-TensorCore)."""
    kind = ""
    try:
        kind = jax.devices()[0].device_kind.lower()
    except Exception:
        pass
    if "v7" in kind:    # 2 TCs/chip, 64 MiB VMEM/TC, ~3.2 TB/s HBM: bigger slabs,
        return 10 * 1024 * 1024, 44 * 1024 * 1024, True   # but leave VMEM headroom.
    if "v5" in kind:    # ~0.8 TB/s HBM: 4 MiB slabs already ~roofline.
        return 4 * 1024 * 1024, 32 * 1024 * 1024, False
    if "v4" in kind:    # megacore: 2 TCs share the chip.
        return 8 * 1024 * 1024, 48 * 1024 * 1024, True
    # v6e / unknown: 128 MiB physical VMEM, single TC.
    return 8 * 1024 * 1024, 48 * 1024 * 1024, False


def _choose_tiles(n, c, hw, itemsize, slab_target, multi_core):
    """Pick (batch_tile, hw_tile): lane-aligned, ~slab_target bytes per x slab."""
    row_bytes = max(c * itemsize, 1)

    # Spatial tile: multiple of 128 lanes, >= 512 elements where possible so the
    # per-vreg XLU reduce amortizes and DMA rows stay >= 2 KiB contiguous.
    if row_bytes * hw <= slab_target:
        thw = hw                                       # whole spatial map fits
    else:
        floor = 512 if hw >= 512 else _LANE
        thw = (slab_target // row_bytes) // _LANE * _LANE
        thw = min(max(thw, floor), hw)

    # Batch tile: fill the remaining byte budget.  Never emit tb in 2..7 (the
    # (TB, C) out-block's second-minor dim must be a multiple of 8 or the full
    # batch); on 2-TC chips keep >= 2 tiles on the parallel batch axis.
    slab_bytes = max(row_bytes * thw, 1)
    tb = max(1, slab_target // slab_bytes)
    if multi_core and n >= 2:
        tb = min(tb, -(-n // 2))
    if tb >= n:
        tb = n
    elif tb >= 8:
        tb = (tb // 8) * 8
    else:
        tb = 1
    return tb, thw


def se_block(x, w1, b1, w2, b2, *, batch_tile=None, hw_tile=None):
    """x: (N, C, H, W) NCHW.  w1: (C//8, C, 1, 1), b1: (C//8,),
    w2: (C, C//8, 1, 1), b2: (C,).  Returns (N, C, 1, 1) like PyTorch."""
    n, c, h, w = x.shape
    cr = w1.shape[0]  # C // 8
    hw = h * w

    slab_target, vmem_limit, multi_core = _hw_params()
    tb, thw = _choose_tiles(n, c, hw, x.dtype.itemsize, slab_target, multi_core)
    if batch_tile is not None:
        tb = max(1, min(batch_tile, n))
    if hw_tile is not None:
        thw = max(1, min(hw_tile, hw))

    x_flat = x.reshape(n, c, hw)          # no jnp.pad: ragged tails handled in-kernel
    w1t = jnp.transpose(w1.reshape(cr, c))    # (C, Cr)
    w2t = jnp.transpose(w2.reshape(c, cr))    # (Cr, C)
    b1r = b1.reshape(1, cr)
    b2r = b2.reshape(1, c)

    grid = (pl.cdiv(n, tb), pl.cdiv(hw, thw))   # (batch: parallel, spatial: reduction)
    ragged_hw = (hw % thw) != 0

    kernel = functools.partial(_se_block_kernel, inv_hw=1.0 / float(hw),
                               hw_total=hw, thw=thw, ragged_hw=ragged_hw)

    cost = pl.CostEstimate(
        flops=int(n * c * hw + 4 * n * c * cr + 4 * n * c),
        transcendentals=int(n * c),
        bytes_accessed=int(x.size * x.dtype.itemsize
                           + n * c * x.dtype.itemsize
                           + 2 * c * cr * w1.dtype.itemsize),
    )

    def build(single_buffer_weights):
        def const_spec(shape):
            idx = lambda b, s: (0,) * len(shape)
            if single_buffer_weights:
                # Grid-invariant weights/biases: single-buffer to save VMEM.
                return pl.BlockSpec(shape, idx, pipeline_mode=pl.Buffered(1))
            return pl.BlockSpec(shape, idx)

        return pl.pallas_call(
            kernel,
            out_shape=jax.ShapeDtypeStruct((n, c), x.dtype),
            grid_spec=pltpu.PrefetchScalarGridSpec(
                num_scalar_prefetch=0,
                grid=grid,
                in_specs=[
                    pl.BlockSpec((tb, c, thw), lambda b, s: (b, 0, s)),
                    const_spec((c, cr)),
                    const_spec((1, cr)),
                    const_spec((cr, c)),
                    const_spec((1, c)),
                ],
                out_specs=pl.BlockSpec((tb, c), lambda b, s: (b, 0)),
                scratch_shapes=[pltpu.VMEM((tb, c), jnp.float32)],
            ),
            compiler_params=pltpu.CompilerParams(
                dimension_semantics=("parallel", "arbitrary"),
                vmem_limit_bytes=vmem_limit,
            ),
            cost_estimate=cost,
        )

    try:
        out = build(True)(x_flat, w1t, b1r, w2t, b2r)
    except Exception:
        # jax builds without pallas_call pipeline_mode support: fall back to
        # default double-buffered weights (still never re-DMA'd).
        out = build(False)(x_flat, w1t, b1r, w2t, b2r)

    return out.reshape(n, c, 1, 1)


def _reference(x, w1, b1, w2, b2):
    # Pure-JAX reference of the PyTorch forward, for verification.
    pooled = jnp.mean(x.astype(jnp.float32), axis=(2, 3))        # (N, C)
    h = pooled @ w1.reshape(w1.shape[0], -1).T + b1              # (N, C//8)
    h = jnp.maximum(h, 0.0)
    y = h @ w2.reshape(w2.shape[0], -1).T + b2                   # (N, C)
    return jax.nn.sigmoid(y)[:, :, None, None].astype(x.dtype)


if __name__ == "__main__":
    # in_channel must be >= 8 so in_channel // 8 >= 1; use C = 16.
    N, C, H, W = 2, 16, 16, 16
    Cr = C // 8

    key = jax.random.PRNGKey(0)
    kx, k1, k2, k3, k4 = jax.random.split(key, 5)

    w1 = 0.1 * jax.random.normal(k1, (Cr, C, 1, 1), dtype=jnp.float32)
    b1 = 0.1 * jax.random.normal(k2, (Cr,), dtype=jnp.float32)
    w2 = 0.1 * jax.random.normal(k3, (C, Cr, 1, 1), dtype=jnp.float32)
    b2 = 0.1 * jax.random.normal(k4, (C,), dtype=jnp.float32)

    def check(xx, **tile_kwargs):
        ref = _reference(xx, w1, b1, w2, b2)
        out = jax.block_until_ready(se_block(xx, w1, b1, w2, b2, **tile_kwargs))
        assert out.shape == ref.shape, (out.shape, ref.shape)
        err = float(jnp.max(jnp.abs(out - ref)))
        assert jnp.allclose(out, ref, atol=1e-5, rtol=1e-5), err

    # (a) auto-tiled path: whole spatial map (HW=256) in one grid step.
    x = jax.random.normal(kx, (N, C, H, W), dtype=jnp.float32)
    check(x)

    # (b) forced multi-step grid: exercises the parallel batch axis and the
    #     spatial reduction / f32 accumulator path (no ragged tiles).
    check(x, batch_tile=1, hw_tile=128)

    # (c) ragged spatial tail handled in-kernel: HW=400 with 128-wide tiles ->
    #     last block has only 16 valid lanes; divide by the true H*W.
    x_c = jax.random.normal(kx, (N, C, 20, 20), dtype=jnp.float32)
    check(x_c, hw_tile=128)

    # (d) ragged batch tail: N=10 with batch tile 8 -> last tile has 2 valid
    #     rows; the out-of-bounds writeback is dropped by Pallas.
    x_d = jax.random.normal(kx, (10, C, 8, 8), dtype=jnp.float32)
    check(x_d, batch_tile=8)

    # (e) odd spatial size with a whole-HW (non-lane-aligned) block: HW=81.
    x_e = jax.random.normal(kx, (N, C, 9, 9), dtype=jnp.float32)
    check(x_e)

    print("KERNEL_OK")
</pallas_src>

<mosaic_0001>
module attributes {stable_mosaic.version = 11 : i64} {
  func.func @_se_block_kernel(%arg0: i32, %arg1: i32, %arg2: memref<2x16x256xf32, #tpu.memory_space<vmem>>, %arg3: memref<16x2xf32, #tpu.memory_space<vmem>>, %arg4: memref<1x2xf32, #tpu.memory_space<vmem>>, %arg5: memref<2x16xf32, #tpu.memory_space<vmem>>, %arg6: memref<1x16xf32, #tpu.memory_space<vmem>>, %arg7: memref<2x16xf32, #tpu.memory_space<vmem>>, %arg8: memref<2x16xf32, #tpu.memory_space<vmem>>) attributes {dimension_semantics = [#tpu.dimension_semantics<parallel>, #tpu.dimension_semantics<arbitrary>], iteration_bounds = array<i64: 1, 1>, scalar_prefetch = 0 : i64, scratch_operands = 1 : i64, tpu.core_type = #tpu.core_type<tc>, window_params = [{transform_indices = @transform_0, window_bounds = array<i64: 2, 16, 256>}, {pipeline_mode = #tpu.pipeline_mode<synchronous>, transform_indices = @transform_1, window_bounds = array<i64: 16, 2>}, {pipeline_mode = #tpu.pipeline_mode<synchronous>, transform_indices = @transform_2, window_bounds = array<i64: 1, 2>}, {pipeline_mode = #tpu.pipeline_mode<synchronous>, transform_indices = @transform_3, window_bounds = array<i64: 2, 16>}, {pipeline_mode = #tpu.pipeline_mode<synchronous>, transform_indices = @transform_4, window_bounds = array<i64: 1, 16>}, {transform_indices = @transform_5, window_bounds = array<i64: 2, 16>}]} {
    %c0_i32 = arith.constant 0 : i32
    %0 = arith.cmpi eq, %arg1, %c0_i32 : i32
    %1 = arith.extui %0 : i1 to i32
    %c0_i32_0 = arith.constant 0 : i32
    %2 = arith.cmpi ne, %1, %c0_i32_0 : i32
    scf.if %2 {
      %cst_9 = arith.constant 0.000000e+00 : f32
      %11 = vector.broadcast %cst_9 : f32 to vector<2x16xf32>
      %c0_10 = arith.constant 0 : index
      %c0_11 = arith.constant 0 : index
      %12 = vector.load %arg8[%c0_10, %c0_11] : memref<2x16xf32, #tpu.memory_space<vmem>>, vector<2x16xf32>
      tpu.vector_store %arg8[%c0_10, %c0_11], %11 {strides = array<i32>} : memref<2x16xf32, #tpu.memory_space<vmem>>, vector<2x16xf32>,
    } else {
    }
    %c0 = arith.constant 0 : index
    %c0_1 = arith.constant 0 : index
    %3 = vector.load %arg8[%c0, %c0_1] : memref<2x16xf32, #tpu.memory_space<vmem>>, vector<2x16xf32>
    %c0_2 = arith.constant 0 : index
    %c0_3 = arith.constant 0 : index
    %c0_4 = arith.constant 0 : index
    %4 = vector.load %arg2[%c0_2, %c0_3, %c0_4] : memref<2x16x256xf32, #tpu.memory_space<vmem>>, vector<2x16x256xf32>
    %cst = arith.constant dense<0.000000e+00> : vector<2x16xf32>
    %5 = vector.multi_reduction <add>, %4, %cst [2] : vector<2x16x256xf32> to vector<2x16xf32>
    %6 = arith.addf %3, %5 : vector<2x16xf32>
    %c0_5 = arith.constant 0 : index
    %c0_6 = arith.constant 0 : index
    %7 = vector.load %arg8[%c0_5, %c0_6] : memref<2x16xf32, #tpu.memory_space<vmem>>, vector<2x16xf32>
    tpu.vector_store %arg8[%c0_5, %c0_6], %6 {strides = array<i32>} : memref<2x16xf32, #tpu.memory_space<vmem>>, vector<2x16xf32>,
    %c0_i32_7 = arith.constant 0 : i32
    %8 = arith.cmpi eq, %arg1, %c0_i32_7 : i32
    %9 = arith.extui %8 : i1 to i32
    %c0_i32_8 = arith.constant 0 : i32
    %10 = arith.cmpi ne, %9, %c0_i32_8 : i32
    scf.if %10 {
      %c0_9 = arith.constant 0 : index
      %c0_10 = arith.constant 0 : index
      %11 = vector.load %arg8[%c0_9, %c0_10] : memref<2x16xf32, #tpu.memory_space<vmem>>, vector<2x16xf32>
      %cst_11 = arith.constant 3.906250e-03 : f32
      %12 = vector.broadcast %cst_11 : f32 to vector<2x16xf32>
      %13 = arith.mulf %11, %12 : vector<2x16xf32>
      %c0_12 = arith.constant 0 : index
      %c0_13 = arith.constant 0 : index
      %14 = vector.load %arg3[%c0_12, %c0_13] : memref<16x2xf32, #tpu.memory_space<vmem>>, vector<16x2xf32>
      %cst_14 = arith.constant dense<0.000000e+00> : vector<2x2xf32>
      %15 = tpu.matmul %13, %14, %cst_14 {dimension_numbers = #tpu.dot_dimension_numbers<[1], [0], [0], [1], [0, 0, 1, 1], [], []>} : vector<2x16xf32>, vector<16x2xf32>, vector<2x2xf32> -> vector<2x2xf32>
      %c0_15 = arith.constant 0 : index
      %c0_16 = arith.constant 0 : index
      %16 = vector.load %arg4[%c0_15, %c0_16] : memref<1x2xf32, #tpu.memory_space<vmem>>, vector<1x2xf32>
      %17 = vector.broadcast %16 : vector<1x2xf32> to vector<2x2xf32>
      %18 = arith.addf %15, %17 : vector<2x2xf32>
      %cst_17 = arith.constant 0.000000e+00 : f32
      %19 = vector.broadcast %cst_17 : f32 to vector<2x2xf32>
      %20 = arith.maximumf %18, %19 : vector<2x2xf32>
      %c0_18 = arith.constant 0 : index
      %c0_19 = arith.constant 0 : index
      %21 = vector.load %arg5[%c0_18, %c0_19] : memref<2x16xf32, #tpu.memory_space<vmem>>, vector<2x16xf32>
      %cst_20 = arith.constant dense<0.000000e+00> : vector<2x16xf32>
      %22 = tpu.matmul %20, %21, %cst_20 {dimension_numbers = #tpu.dot_dimension_numbers<[1], [0], [0], [1], [0, 0, 1, 1], [], []>} : vector<2x2xf32>, vector<2x16xf32>, vector<2x16xf32> -> vector<2x16xf32>
      %c0_21 = arith.constant 0 : index
      %c0_22 = arith.constant 0 : index
      %23 = vector.load %arg6[%c0_21, %c0_22] : memref<1x16xf32, #tpu.memory_space<vmem>>, vector<1x16xf32>
      %24 = vector.broadcast %23 : vector<1x16xf32> to vector<2x16xf32>
      %25 = arith.addf %22, %24 : vector<2x16xf32>
      %26 = arith.negf %25 : vector<2x16xf32>
      %27 = math.exp %26 : vector<2x16xf32>
      %cst_23 = arith.constant 1.000000e+00 : f32
      %28 = vector.broadcast %cst_23 : f32 to vector<2x16xf32>
      %29 = arith.addf %28, %27 : vector<2x16xf32>
      %30 = arith.divf %28, %29 : vector<2x16xf32>
      %c0_24 = arith.constant 0 : index
      %c0_25 = arith.constant 0 : index
      %31 = vector.load %arg7[%c0_24, %c0_25] : memref<2x16xf32, #tpu.memory_space<vmem>>, vector<2x16xf32>
      tpu.vector_store %arg7[%c0_24, %c0_25], %30 {strides = array<i32>} : memref<2x16xf32, #tpu.memory_space<vmem>>, vector<2x16xf32>,
    } else {
    }
    return
  }
  func.func @transform_0(%arg0: i32, %arg1: i32) -> (i32, i32, i32) {
    %c0_i32 = arith.constant 0 : i32
    %c0_i32_0 = arith.constant 0 : i32
    return %arg0, %c0_i32, %arg1 : i32, i32, i32
  }
  func.func @transform_1(%arg0: i32, %arg1: i32) -> (i32, i32) {
    %c0_i32 = arith.constant 0 : i32
    %c0_i32_0 = arith.constant 0 : i32
    %c0_i32_1 = arith.constant 0 : i32
    return %c0_i32, %c0_i32_0 : i32, i32
  }
  func.func @transform_2(%arg0: i32, %arg1: i32) -> (i32, i32) {
    %c0_i32 = arith.constant 0 : i32
    %c0_i32_0 = arith.constant 0 : i32
    %c0_i32_1 = arith.constant 0 : i32
    return %c0_i32, %c0_i32_0 : i32, i32
  }
  func.func @transform_3(%arg0: i32, %arg1: i32) -> (i32, i32) {
    %c0_i32 = arith.constant 0 : i32
    %c0_i32_0 = arith.constant 0 : i32
    %c0_i32_1 = arith.constant 0 : i32
    return %c0_i32, %c0_i32_0 : i32, i32
  }
  func.func @transform_4(%arg0: i32, %arg1: i32) -> (i32, i32) {
    %c0_i32 = arith.constant 0 : i32
    %c0_i32_0 = arith.constant 0 : i32
    %c0_i32_1 = arith.constant 0 : i32
    return %c0_i32, %c0_i32_0 : i32, i32
  }
  func.func @transform_5(%arg0: i32, %arg1: i32) -> (i32, i32) {
    %c0_i32 = arith.constant 0 : i32
    %c0_i32_0 = arith.constant 0 : i32
    return %arg0, %c0_i32 : i32, i32
  }
}

module attributes {stable_mosaic.version = 11 : i64} {
  func.func @_se_block_kernel(%arg0: i32, %arg1: i32, %arg2: memref<2x16x256xf32, #tpu.memory_space<vmem>>, %arg3: memref<16x2xf32, #tpu.memory_space<vmem>>, %arg4: memref<1x2xf32, #tpu.memory_space<vmem>>, %arg5: memref<2x16xf32, #tpu.memory_space<vmem>>, %arg6: memref<1x16xf32, #tpu.memory_space<vmem>>, %arg7: memref<2x16xf32, #tpu.memory_space<vmem>>, %arg8: memref<2x16xf32, #tpu.memory_space<vmem>>) attributes {dimension_semantics = [#tpu.dimension_semantics<parallel>, #tpu.dimension_semantics<arbitrary>], iteration_bounds = array<i64: 1, 1>, scalar_prefetch = 0 : i64, scratch_operands = 1 : i64, tpu.core_type = #tpu.core_type<tc>, window_params = [{transform_indices = @transform_0, window_bounds = array<i64: 2, 16, 256>}, {pipeline_mode = #tpu.pipeline_mode<synchronous>, transform_indices = @transform_1, window_bounds = array<i64: 16, 2>}, {pipeline_mode = #tpu.pipeline_mode<synchronous>, transform_indices = @transform_2, window_bounds = array<i64: 1, 2>}, {pipeline_mode = #tpu.pipeline_mode<synchronous>, transform_indices = @transform_3, window_bounds = array<i64: 2, 16>}, {pipeline_mode = #tpu.pipeline_mode<synchronous>, transform_indices = @transform_4, window_bounds = array<i64: 1, 16>}, {transform_indices = @transform_5, window_bounds = array<i64: 2, 16>}]} {
    %c0_i32 = arith.constant 0 : i32
    %0 = arith.cmpi eq, %arg1, %c0_i32 : i32
    %1 = arith.extui %0 : i1 to i32
    %c0_i32_0 = arith.constant 0 : i32
    %2 = arith.cmpi ne, %1, %c0_i32_0 : i32
    scf.if %2 {
      %cst_9 = arith.constant 0.000000e+00 : f32
      %11 = vector.broadcast %cst_9 : f32 to vector<2x16xf32>
      %c0_10 = arith.constant 0 : index
      %c0_11 = arith.constant 0 : index
      %12 = vector.load %arg8[%c0_10, %c0_11] : memref<2x16xf32, #tpu.memory_space<vmem>>, vector<2x16xf32>
      tpu.vector_store %arg8[%c0_10, %c0_11], %11 {strides = array<i32>} : memref<2x16xf32, #tpu.memory_space<vmem>>, vector<2x16xf32>,
    } else {
    }
    %c0 = arith.constant 0 : index
    %c0_1 = arith.constant 0 : index
    %3 = vector.load %arg8[%c0, %c0_1] : memref<2x16xf32, #tpu.memory_space<vmem>>, vector<2x16xf32>
    %c0_2 = arith.constant 0 : index
    %c0_3 = arith.constant 0 : index
    %c0_4 = arith.constant 0 : index
    %4 = vector.load %arg2[%c0_2, %c0_3, %c0_4] : memref<2x16x256xf32, #tpu.memory_space<vmem>>, vector<2x16x256xf32>
    %cst = arith.constant dense<0.000000e+00> : vector<2x16xf32>
    %5 = vector.multi_reduction <add>, %4, %cst [2] : vector<2x16x256xf32> to vector<2x16xf32>
    %6 = arith.addf %3, %5 : vector<2x16xf32>
    %c0_5 = arith.constant 0 : index
    %c0_6 = arith.constant 0 : index
    %7 = vector.load %arg8[%c0_5, %c0_6] : memref<2x16xf32, #tpu.memory_space<vmem>>, vector<2x16xf32>
    tpu.vector_store %arg8[%c0_5, %c0_6], %6 {strides = array<i32>} : memref<2x16xf32, #tpu.memory_space<vmem>>, vector<2x16xf32>,
    %c0_i32_7 = arith.constant 0 : i32
    %8 = arith.cmpi eq, %arg1, %c0_i32_7 : i32
    %9 = arith.extui %8 : i1 to i32
    %c0_i32_8 = arith.constant 0 : i32
    %10 = arith.cmpi ne, %9, %c0_i32_8 : i32
    scf.if %10 {
      %c0_9 = arith.constant 0 : index
      %c0_10 = arith.constant 0 : index
      %11 = vector.load %arg8[%c0_9, %c0_10] : memref<2x16xf32, #tpu.memory_space<vmem>>, vector<2x16xf32>
      %cst_11 = arith.constant 3.906250e-03 : f32
      %12 = vector.broadcast %cst_11 : f32 to vector<2x16xf32>
      %13 = arith.mulf %11, %12 : vector<2x16xf32>
      %c0_12 = arith.constant 0 : index
      %c0_13 = arith.constant 0 : index
      %14 = vector.load %arg3[%c0_12, %c0_13] : memref<16x2xf32, #tpu.memory_space<vmem>>, vector<16x2xf32>
      %cst_14 = arith.constant dense<0.000000e+00> : vector<2x2xf32>
      %15 = tpu.matmul %13, %14, %cst_14 {dimension_numbers = #tpu.dot_dimension_numbers<[1], [0], [0], [1], [0, 0, 1, 1], [], []>} : vector<2x16xf32>, vector<16x2xf32>, vector<2x2xf32> -> vector<2x2xf32>
      %c0_15 = arith.constant 0 : index
      %c0_16 = arith.constant 0 : index
      %16 = vector.load %arg4[%c0_15, %c0_16] : memref<1x2xf32, #tpu.memory_space<vmem>>, vector<1x2xf32>
      %17 = vector.broadcast %16 : vector<1x2xf32> to vector<2x2xf32>
      %18 = arith.addf %15, %17 : vector<2x2xf32>
      %cst_17 = arith.constant 0.000000e+00 : f32
      %19 = vector.broadcast %cst_17 : f32 to vector<2x2xf32>
      %20 = arith.maximumf %18, %19 : vector<2x2xf32>
      %c0_18 = arith.constant 0 : index
      %c0_19 = arith.constant 0 : index
      %21 = vector.load %arg5[%c0_18, %c0_19] : memref<2x16xf32, #tpu.memory_space<vmem>>, vector<2x16xf32>
      %cst_20 = arith.constant dense<0.000000e+00> : vector<2x16xf32>
      %22 = tpu.matmul %20, %21, %cst_20 {dimension_numbers = #tpu.dot_dimension_numbers<[1], [0], [0], [1], [0, 0, 1, 1], [], []>} : vector<2x2xf32>, vector<2x16xf32>, vector<2x16xf32> -> vector<2x16xf32>
      %c0_21 = arith.constant 0 : index
      %c0_22 = arith.constant 0 : index
      %23 = vector.load %arg6[%c0_21, %c0_22] : memref<1x16xf32, #tpu.memory_space<vmem>>, vector<1x16xf32>
      %24 = vector.broadcast %23 : vector<1x16xf32> to vector<2x16xf32>
      %25 = arith.addf %22, %24 : vector<2x16xf32>
      %26 = arith.negf %25 : vector<2x16xf32>
      %27 = math.exp %26 : vector<2x16xf32>
      %cst_23 = arith.constant 1.000000e+00 : f32
      %28 = vector.broadcast %cst_23 : f32 to vector<2x16xf32>
      %29 = arith.addf %28, %27 : vector<2x16xf32>
      %30 = arith.divf %28, %29 : vector<2x16xf32>
      %c0_24 = arith.constant 0 : index
      %c0_25 = arith.constant 0 : index
      %31 = vector.load %arg7[%c0_24, %c0_25] : memref<2x16xf32, #tpu.memory_space<vmem>>, vector<2x16xf32>
      tpu.vector_store %arg7[%c0_24, %c0_25], %30 {strides = array<i32>} : memref<2x16xf32, #tpu.memory_space<vmem>>, vector<2x16xf32>,
    } else {
    }
    return
  }
  func.func @transform_0(%arg0: i32, %arg1: i32) -> (i32, i32, i32) {
    %c0_i32 = arith.constant 0 : i32
    %c0_i32_0 = arith.constant 0 : i32
    return %arg0, %c0_i32, %arg1 : i32, i32, i32
  }
  func.func @transform_1(%arg0: i32, %arg1: i32) -> (i32, i32) {
    %c0_i32 = arith.constant 0 : i32
    %c0_i32_0 = arith.constant 0 : i32
    %c0_i32_1 = arith.constant 0 : i32
    return %c0_i32, %c0_i32_0 : i32, i32
  }
  func.func @transform_2(%arg0: i32, %arg1: i32) -> (i32, i32) {
    %c0_i32 = arith.constant 0 : i32
    %c0_i32_0 = arith.constant 0 : i32
    %c0_i32_1 = arith.constant 0 : i32
    return %c0_i32, %c0_i32_0 : i32, i32
  }
  func.func @transform_3(%arg0: i32, %arg1: i32) -> (i32, i32) {
    %c0_i32 = arith.constant 0 : i32
    %c0_i32_0 = arith.constant 0 : i32
    %c0_i32_1 = arith.constant 0 : i32
    return %c0_i32, %c0_i32_0 : i32, i32
  }
  func.func @transform_4(%arg0: i32, %arg1: i32) -> (i32, i32) {
    %c0_i32 = arith.constant 0 : i32
    %c0_i32_0 = arith.constant 0 : i32
    %c0_i32_1 = arith.constant 0 : i32
    return %c0_i32, %c0_i32_0 : i32, i32
  }
  func.func @transform_5(%arg0: i32, %arg1: i32) -> (i32, i32) {
    %c0_i32 = arith.constant 0 : i32
    %c0_i32_0 = arith.constant 0 : i32
    return %arg0, %c0_i32 : i32, i32
  }
}

</mosaic_0001>

<bundles_post_ra>
// kernel: tpu_custom_call.1
= control target key start
LH: loop header
LB: loop body
LE: loop exit
PB: predicated region body
PF: predicated region fallthrough
CT: control target
= control target key end

     0   :  { %10 = vsyncpa [#allocation4], 0  ;;  %s455_s0 = inlined_call_operand.hbm [shape: f32[2,16,256], index: 0, kind: input, shape index: {}]   ;;  %s456_s1 = inlined_call_operand.vmem [shape: f32[16,2], index: 1, kind: input, shape index: {}]   ;;  %s457_s2 = inlined_call_operand.vmem [shape: f32[1,2], index: 2, kind: input, shape index: {}]   ;;  %s458_s3 = inlined_call_operand.vmem [shape: f32[2,16], index: 3, kind: input, shape index: {}]   ;;  %s459_s4 = inlined_call_operand.vmem [shape: f32[1,16], index: 4, kind: input, shape index: {}]   ;;  %s460_s5 = inlined_call_operand.hbm [shape: f32[2,16], index: 5, kind: output, shape index: {}]  }
   0x1   :  { %11 = vsyncpa [#allocation5], 0  ;;  %s376_s18 = smov [#allocation3]   ;;  %s328_s22 = scalar_lea.hbm %s455_s0, 1024 }
   0x2   :  { %s17_s19 = sshll.u32 %s376_s18, 4  ;;  %p329_p0 = scmp.ne.s32.totalorder %s455_s0, %s328_s22  ;;  %s18_s19 = int_to_ptr.vmem [resolvable:$true] %s17_s19 }
   0x3   :  { %p332_p1 = scmp.lt.u32.totalorder %s328_s22, %s455_s0 }
   0x5   :  { %p334_p2 = pnand %p332_p1, %p329_p0 }
   0x7   :  { %337 = shalt.err (!%p334_p2)
}
   0x8   :  { %s338_s27 = scalar_lea.vmem %s18_s19, 1024  ;;  %p343_p4 = scmp.lt.s32.totalorder %s18_s19, %s18_s19 }
   0x9   :  { %p339_p3 = scmp.ne.s32.totalorder %s18_s19, %s338_s27  ;;  %p344_p5 = scmp.lt.s32.totalorder %s338_s27, %s338_s27 }
   0xb   :  { %p345_p6 = por %p344_p5, %p343_p4 }
   0xd   :  { %p346_p7 = pnand %p345_p6, %p339_p3 }
   0xf   :  { %349 = shalt.err (!%p346_p7)
}
  0x10   :  { %s377_s28 = smov 256   ;;  %s378_s29 = smov 16  }
  0x11   :  { %23 = dma.hbm_to_vmem [thread:$0]  %s455_s0, 1024, %s18_s19, [#allocation4], %s377_s28, %s377_s28, %s378_s29  }
  0x12   :  { %372 = dma.done.wait [#allocation4], 1024  }
  0x13   :  { %373 = vsyncadd [#allocation4], 4294966272  ;;  %v46_v0 = vld [vmem:[#allocation3 + $0x20] sm:$0xff]  ;;  %v47_v1 = vld [vmem:[#allocation3 + $0x28] sm:$0xff]  ;;  %vm39_vm0 = vcmask 123904   ;;  %v379_v12 = vmov 0.0   ;;  %v66_v17 = vlaneseq }
  0x14   :  { %v42_v2 = vld [vmem:[#allocation3] sm:$0xff]  ;;  %v56_v3 = vadd.f32 %v47_v1, %v46_v0  ;;  %v43_v4 = vld [vmem:[#allocation3 + $0x8] sm:$0xff]  ;;  %v48_v5 = vld [vmem:[#allocation3 + $0x30] sm:$0xff]  ;;  %40 = vst.msk [vmem:[#allocation2] sm:$0x3] %vm39_vm0, %v379_v12  ;;  %309 = vmatprep.subr.mxu1 %v379_v12  ;;  %v380_v15 = vmov 0.0|0.0  }
  0x15   :  { %v49_v6 = vld [vmem:[#allocation3 + $0x38] sm:$0xff]  ;;  %v50_v7 = vadd.f32 %v43_v4, %v42_v2  ;;  %v44_v8 = vld [vmem:[#allocation3 + $0x10] sm:$0xff]  ;;  %v100_v14 = vld [vmem:[%s456_s1 + $0x8] sm:$0xff]  ;;  %314 = vmatprep.subr.bf16.mxu0 %v380_v15  ;;  %vm381_vm1 = vmmov 0   ;;  %v67_v18 = vand.u32 127, %v66_v17  ;;  %v69_v19 = vshrl.u32 %v66_v17, 7 }
  0x16   :  { %v45_v9 = vld [vmem:[#allocation3 + $0x18] sm:$0xff]  ;;  %57 = vadd.xlane.f32.xlu1 %v56_v3  ;;  %v59_v10 = vadd.f32 %v49_v6, %v48_v5  ;;  %306 = vmatprep.mubr.msk.f32.mxu0 %vm381_vm1, %v379_v12  ;;  %vm77_vm2 = vcmask 130112   ;;  %vm88_vm3 = vcmask 1041409   ;;  %vm108_vm4 = vcmask 130048  }
  0x17   :  { %51 = vadd.xlane.f32.xlu0 %v50_v7  ;;  %v53_v11 = vadd.f32 %v45_v9, %v44_v8  ;;  %v99_v13 = vld [vmem:[%s456_s1] sm:$0xff]  ;;  %311 = vmatprep.mubr.msk.f32.mxu1 %vm381_vm1, %v379_v12  ;;  %v72_v20 = vadd.s32 4294967288, %v67_v18  ;;  %v70_v22 = vsub.s32 %v67_v18, %v69_v19  ;;  %vm195_vm5 = vcmask 1041408  }
  0x18   :  { %v315_v16 = vpack.c.bf16 %v100_v14, %v99_v13  ;;  %v183_v38 = vld [vmem:[%s458_s3] sm:$0x3]  ;;  %vm191_vm6 = vcmask 15360   ;;  %s382_s3 = smov [#allocation6]  }
  0x19   :  { %v75_v24 = vsub.s32 %v72_v20, %v69_v19  ;;  %310 = vmatpush3.msk.msra.mxu1 %vm195_vm5, %v183_v38  ;;  %v291_v39 = vld [vmem:[%s457_s2] ss:$0 sm:$0xff]  ;;  %s282_s2 = sshll.u32 %s382_s3, 4  ;;  %s283_s2 = int_to_ptr.vmem [resolvable:$true] %s282_s2 }
  0x1a   :  { %60 = vadd.xlane.f32.xlu1 %v59_v10  ;;  %316 = vmatpush3.bf16.msra.mxu0 %v315_v16  ;;  %v293_v44 = vld [vmem:[%s459_s4] ss:$0 sm:$0xff]  ;;  %s350_s15 = scalar_lea.vmem %s283_s2, 32  ;;  %p355_p9 = scmp.lt.s32.totalorder %s283_s2, %s283_s2 }
  0x1b   :  { %54 = vadd.xlane.f32.xlu0 %v53_v11  ;;  %v41_v32 = vld [vmem:[#allocation2] sm:$0x3]  ;;  %p351_p8 = scmp.ne.s32.totalorder %s283_s2, %s350_s15  ;;  %p356_p10 = scmp.lt.s32.totalorder %s350_s15, %s350_s15 }
  0x1d   :  { %p357_p11 = por %p356_p10, %p355_p9 }
  0x1f   :  { %p358_p12 = pnand %p357_p11, %p351_p8 }
  0xa3   :  { %v58_v21 = vpop.xlane.xlu1 %57 }
  0xa4   :  { %v52_v23 = vpop.xlane.xlu0 %51  ;;  %v82_v26 = vrot.slane %v58_v21, %v70_v22 }
  0xa5   :  { %v71_v29 = vrot.slane %v52_v23, %v70_v22 }
  0xa7   :  { %v61_v25 = vpop.xlane.xlu1 %60 }
  0xa8   :  { %v86_v27 = vrot.slane %v61_v25, %v75_v24  ;;  %v55_v28 = vpop.xlane.xlu0 %54 }
  0xa9   :  { %v76_v30 = vrot.slane %v55_v28, %v75_v24 }
  0xaa   :  { %v87_v31 = vsel %vm77_vm2, %v86_v27, %v82_v26 }
  0xab   :  { %v78_v33 = vsel %vm77_vm2, %v76_v30, %v71_v29 }
  0xac   :  { %v89_v34 = vsel %vm88_vm3, %v87_v31, %v78_v33 }
  0xad   :  { %v91_v35 = vadd.f32 %v89_v34, %v41_v32 }
  0xaf   :  { %93 = vst.msk [vmem:[#allocation2] sm:$0x3] %vm39_vm0, %v91_v35 }
  0xb6   :  { %v97_v36 = vld [vmem:[#allocation2] sm:$0x3] }
  0xb7   :  { %v98_v37 = vmul.f32 0.00390625, %v97_v36 }
  0xb9   :  { %307 = vmatmul.mubr.msk.f32.vlgmr.msra.gmra.mrb[0].mxu0 %vm108_vm4, %v98_v37 }
 0x18c   :  { %v178_v40 = vpop.f32.mrb[0].mxu0 }
 0x18d   :  { %v179_v41 = vadd.f32 %v291_v39, %v178_v40  ;;  %v308_v42 = vpop.f32.mrb[1].mxu0 }
 0x18f   :  { %v182_v43 = vmax.f32 %v179_v41, 0.0 }
 0x191   :  { %312 = vmatmul.mubr.msk.f32.vlgmr.msra.gmra.mrb[0].mxu1 %vm191_vm6, %v182_v43 }
 0x264   :  { %v265_v45 = vpop.f32.mrb[0].mxu1 }
 0x265   :  { %v266_v46 = vadd.f32 %v293_v44, %v265_v45  ;;  %v313_v47 = vpop.f32.mrb[1].mxu1 }
 0x267   :  { %v296_v48 = vmul.f32 -1.442695, %v266_v46 }
 0x269   :  { %324 = vpow2.f32 %v296_v48 }
 0x273   :  { %v325_v49 = vpop.eup %324 }
 0x274   :  { %v272_v50 = vadd.f32 1.0, %v325_v49 }
 0x276   :  { %326 = vrcp.f32 %v272_v50 }
 0x280   :  { %v327_v51 = vpop.eup %326 }
 0x281   :  { %275 = vst.msk [vmem:[#allocation6] sm:$0x3] %vm39_vm0, %v327_v51 }
 0x282   :  { %361 = shalt.err (!%p358_p12)
}
 0x283   :  { %s362_s17 = scalar_lea.hbm %s460_s5, 32 }
 0x284   :  { %p363_p13 = scmp.ne.s32.totalorder %s460_s5, %s362_s17  ;;  %p366_p0 = scmp.lt.u32.totalorder %s362_s17, %s460_s5 }
 0x286   :  { %p368_p1 = pnand %p366_p0, %p363_p13 }
 0x288   :  { %371 = shalt.err (!%p368_p1)
}
 0x289   :  { %285 = dma.vmem_to_hbm [thread:$0]  %s283_s2, 32, %s460_s5, [#allocation5]  }
 0x28a   :  { %374 = dma.done.wait [#allocation5], 32  }
 0x28b   :  { %375 = vsyncadd [#allocation5], 4294967264 }
 0x28c   :  { %289 = vsyncpa [#allocation4], 1 }
 0x28d   :  { %290 = vsyncpa [#allocation5], 1 }

// kernel: tpu_custom_call.1
= control target key start
LH: loop header
LB: loop body
LE: loop exit
PB: predicated region body
PF: predicated region fallthrough
CT: control target
= control target key end

     0   :  { %10 = vsyncpa [#allocation4], 0  ;;  %s455_s0 = inlined_call_operand.hbm [shape: f32[2,16,256], index: 0, kind: input, shape index: {}]   ;;  %s456_s1 = inlined_call_operand.vmem [shape: f32[16,2], index: 1, kind: input, shape index: {}]   ;;  %s457_s2 = inlined_call_operand.vmem [shape: f32[1,2], index: 2, kind: input, shape index: {}]   ;;  %s458_s3 = inlined_call_operand.vmem [shape: f32[2,16], index: 3, kind: input, shape index: {}]   ;;  %s459_s4 = inlined_call_operand.vmem [shape: f32[1,16], index: 4, kind: input, shape index: {}]   ;;  %s460_s5 = inlined_call_operand.hbm [shape: f32[2,16], index: 5, kind: output, shape index: {}]  }
   0x1   :  { %11 = vsyncpa [#allocation5], 0  ;;  %s376_s18 = smov [#allocation3]   ;;  %s328_s22 = scalar_lea.hbm %s455_s0, 1024 }
   0x2   :  { %s17_s19 = sshll.u32 %s376_s18, 4  ;;  %p329_p0 = scmp.ne.s32.totalorder %s455_s0, %s328_s22  ;;  %s18_s19 = int_to_ptr.vmem [resolvable:$true] %s17_s19 }
   0x3   :  { %p332_p1 = scmp.lt.u32.totalorder %s328_s22, %s455_s0 }
   0x5   :  { %p334_p2 = pnand %p332_p1, %p329_p0 }
   0x7   :  { %337 = shalt.err (!%p334_p2)
}
   0x8   :  { %s338_s27 = scalar_lea.vmem %s18_s19, 1024  ;;  %p343_p4 = scmp.lt.s32.totalorder %s18_s19, %s18_s19 }
   0x9   :  { %p339_p3 = scmp.ne.s32.totalorder %s18_s19, %s338_s27  ;;  %p344_p5 = scmp.lt.s32.totalorder %s338_s27, %s338_s27 }
   0xb   :  { %p345_p6 = por %p344_p5, %p343_p4 }
   0xd   :  { %p346_p7 = pnand %p345_p6, %p339_p3 }
   0xf   :  { %349 = shalt.err (!%p346_p7)
}
  0x10   :  { %s377_s28 = smov 256   ;;  %s378_s29 = smov 16  }
  0x11   :  { %23 = dma.hbm_to_vmem [thread:$0]  %s455_s0, 1024, %s18_s19, [#allocation4], %s377_s28, %s377_s28, %s378_s29  }
  0x12   :  { %372 = dma.done.wait [#allocation4], 1024  }
  0x13   :  { %373 = vsyncadd [#allocation4], 4294966272  ;;  %v46_v0 = vld [vmem:[#allocation3 + $0x20] sm:$0xff]  ;;  %v47_v1 = vld [vmem:[#allocation3 + $0x28] sm:$0xff]  ;;  %vm39_vm0 = vcmask 123904   ;;  %v379_v12 = vmov 0.0   ;;  %v66_v17 = vlaneseq }
  0x14   :  { %v42_v2 = vld [vmem:[#allocation3] sm:$0xff]  ;;  %v56_v3 = vadd.f32 %v47_v1, %v46_v0  ;;  %v43_v4 = vld [vmem:[#allocation3 + $0x8] sm:$0xff]  ;;  %v48_v5 = vld [vmem:[#allocation3 + $0x30] sm:$0xff]  ;;  %40 = vst.msk [vmem:[#allocation2] sm:$0x3] %vm39_vm0, %v379_v12  ;;  %309 = vmatprep.subr.mxu1 %v379_v12  ;;  %v380_v15 = vmov 0.0|0.0  }
  0x15   :  { %v49_v6 = vld [vmem:[#allocation3 + $0x38] sm:$0xff]  ;;  %v50_v7 = vadd.f32 %v43_v4, %v42_v2  ;;  %v44_v8 = vld [vmem:[#allocation3 + $0x10] sm:$0xff]  ;;  %v100_v14 = vld [vmem:[%s456_s1 + $0x8] sm:$0xff]  ;;  %314 = vmatprep.subr.bf16.mxu0 %v380_v15  ;;  %vm381_vm1 = vmmov 0   ;;  %v67_v18 = vand.u32 127, %v66_v17  ;;  %v69_v19 = vshrl.u32 %v66_v17, 7 }
  0x16   :  { %v45_v9 = vld [vmem:[#allocation3 + $0x18] sm:$0xff]  ;;  %57 = vadd.xlane.f32.xlu1 %v56_v3  ;;  %v59_v10 = vadd.f32 %v49_v6, %v48_v5  ;;  %306 = vmatprep.mubr.msk.f32.mxu0 %vm381_vm1, %v379_v12  ;;  %vm77_vm2 = vcmask 130112   ;;  %vm88_vm3 = vcmask 1041409   ;;  %vm108_vm4 = vcmask 130048  }
  0x17   :  { %51 = vadd.xlane.f32.xlu0 %v50_v7  ;;  %v53_v11 = vadd.f32 %v45_v9, %v44_v8  ;;  %v99_v13 = vld [vmem:[%s456_s1] sm:$0xff]  ;;  %311 = vmatprep.mubr.msk.f32.mxu1 %vm381_vm1, %v379_v12  ;;  %v72_v20 = vadd.s32 4294967288, %v67_v18  ;;  %v70_v22 = vsub.s32 %v67_v18, %v69_v19  ;;  %vm195_vm5 = vcmask 1041408  }
  0x18   :  { %v315_v16 = vpack.c.bf16 %v100_v14, %v99_v13  ;;  %v183_v38 = vld [vmem:[%s458_s3] sm:$0x3]  ;;  %vm191_vm6 = vcmask 15360   ;;  %s382_s3 = smov [#allocation6]  }
  0x19   :  { %v75_v24 = vsub.s32 %v72_v20, %v69_v19  ;;  %310 = vmatpush3.msk.msra.mxu1 %vm195_vm5, %v183_v38  ;;  %v291_v39 = vld [vmem:[%s457_s2] ss:$0 sm:$0xff]  ;;  %s282_s2 = sshll.u32 %s382_s3, 4  ;;  %s283_s2 = int_to_ptr.vmem [resolvable:$true] %s282_s2 }
  0x1a   :  { %60 = vadd.xlane.f32.xlu1 %v59_v10  ;;  %316 = vmatpush3.bf16.msra.mxu0 %v315_v16  ;;  %v293_v44 = vld [vmem:[%s459_s4] ss:$0 sm:$0xff]  ;;  %s350_s15 = scalar_lea.vmem %s283_s2, 32  ;;  %p355_p9 = scmp.lt.s32.totalorder %s283_s2, %s283_s2 }
  0x1b   :  { %54 = vadd.xlane.f32.xlu0 %v53_v11  ;;  %v41_v32 = vld [vmem:[#allocation2] sm:$0x3]  ;;  %p351_p8 = scmp.ne.s32.totalorder %s283_s2, %s350_s15  ;;  %p356_p10 = scmp.lt.s32.totalorder %s350_s15, %s350_s15 }
  0x1d   :  { %p357_p11 = por %p356_p10, %p355_p9 }
  0x1f   :  { %p358_p12 = pnand %p357_p11, %p351_p8 }
  0xa3   :  { %v58_v21 = vpop.xlane.xlu1 %57 }
  0xa4   :  { %v52_v23 = vpop.xlane.xlu0 %51  ;;  %v82_v26 = vrot.slane %v58_v21, %v70_v22 }
  0xa5   :  { %v71_v29 = vrot.slane %v52_v23, %v70_v22 }
  0xa7   :  { %v61_v25 = vpop.xlane.xlu1 %60 }
  0xa8   :  { %v86_v27 = vrot.slane %v61_v25, %v75_v24  ;;  %v55_v28 = vpop.xlane.xlu0 %54 }
  0xa9   :  { %v76_v30 = vrot.slane %v55_v28, %v75_v24 }
  0xaa   :  { %v87_v31 = vsel %vm77_vm2, %v86_v27, %v82_v26 }
  0xab   :  { %v78_v33 = vsel %vm77_vm2, %v76_v30, %v71_v29 }
  0xac   :  { %v89_v34 = vsel %vm88_vm3, %v87_v31, %v78_v33 }
  0xad   :  { %v91_v35 = vadd.f32 %v89_v34, %v41_v32 }
  0xaf   :  { %93 = vst.msk [vmem:[#allocation2] sm:$0x3] %vm39_vm0, %v91_v35 }
  0xb6   :  { %v97_v36 = vld [vmem:[#allocation2] sm:$0x3] }
  0xb7   :  { %v98_v37 = vmul.f32 0.00390625, %v97_v36 }
  0xb9   :  { %307 = vmatmul.mubr.msk.f32.vlgmr.msra.gmra.mrb[0].mxu0 %vm108_vm4, %v98_v37 }
 0x18c   :  { %v178_v40 = vpop.f32.mrb[0].mxu0 }
 0x18d   :  { %v179_v41 = vadd.f32 %v291_v39, %v178_v40  ;;  %v308_v42 = vpop.f32.mrb[1].mxu0 }
 0x18f   :  { %v182_v43 = vmax.f32 %v179_v41, 0.0 }
 0x191   :  { %312 = vmatmul.mubr.msk.f32.vlgmr.msra.gmra.mrb[0].mxu1 %vm191_vm6, %v182_v43 }
 0x264   :  { %v265_v45 = vpop.f32.mrb[0].mxu1 }
 0x265   :  { %v266_v46 = vadd.f32 %v293_v44, %v265_v45  ;;  %v313_v47 = vpop.f32.mrb[1].mxu1 }
 0x267   :  { %v296_v48 = vmul.f32 -1.442695, %v266_v46 }
 0x269   :  { %324 = vpow2.f32 %v296_v48 }
 0x273   :  { %v325_v49 = vpop.eup %324 }
 0x274   :  { %v272_v50 = vadd.f32 1.0, %v325_v49 }
 0x276   :  { %326 = vrcp.f32 %v272_v50 }
 0x280   :  { %v327_v51 = vpop.eup %326 }
 0x281   :  { %275 = vst.msk [vmem:[#allocation6] sm:$0x3] %vm39_vm0, %v327_v51 }
 0x282   :  { %361 = shalt.err (!%p358_p12)
}
 0x283   :  { %s362_s17 = scalar_lea.hbm %s460_s5, 32 }
 0x284   :  { %p363_p13 = scmp.ne.s32.totalorder %s460_s5, %s362_s17  ;;  %p366_p0 = scmp.lt.u32.totalorder %s362_s17, %s460_s5 }
 0x286   :  { %p368_p1 = pnand %p366_p0, %p363_p13 }
 0x288   :  { %371 = shalt.err (!%p368_p1)
}
 0x289   :  { %285 = dma.vmem_to_hbm [thread:$0]  %s283_s2, 32, %s460_s5, [#allocation5]  }
 0x28a   :  { %374 = dma.done.wait [#allocation5], 32  }
 0x28b   :  { %375 = vsyncadd [#allocation5], 4294967264 }
 0x28c   :  { %289 = vsyncpa [#allocation4], 1 }
 0x28d   :  { %290 = vsyncpa [#allocation5], 1 }

</bundles_post_ra>
